<compile_context>
chip_gen: v5e
topology: v5e:2x2
jax: 0.10.0
libtpu: 0.0.40
codegen_flags: <defaults>
</compile_context>

<pallas_src>
import functools

import jax
import jax.numpy as jnp
from jax.experimental import pallas as pl
from jax.experimental.pallas import tpu as pltpu


def _round_up(v, m):
    return ((v + m - 1) // m) * m


def _vq_kernel(x_ref, embed_ref, embed_t_ref, e_sq_half_ref, out_ref, *loss_refs,
               t_total, use_bf16_matmul):
    """Quantize one (C, TILE_T) tile of x (T on the lane axis).

    x_ref:          (1, C, TT) f32 input tile (tail block may be ragged)
    embed_ref:      (K, C)     f32 codebook
    embed_t_ref:    (C, K)     f32 codebook, pre-transposed (gather matmul)
    e_sq_half_ref:  (K, 1)     f32 0.5 * per-code squared norms (precomputed)
    out_ref:        (1, C, TT) f32 quantized output tile
    loss_refs[0]:   (1, 1, 8, 128) f32 optional per-tile sum of (q - x)^2
    """
    x = x_ref[0]                       # (C, TT)
    e = embed_ref[...]                 # (K, C)
    e_t = embed_t_ref[...]             # (C, K)
    e_sq_half = e_sq_half_ref[...]     # (K, 1)
    k = e.shape[0]
    tt = x.shape[1]

    # argmax_k( x.e_k - 0.5*||e_k||^2 ) == argmin_k ||x - e_k||^2 ; the
    # -||x||^2 term of the true distance is constant per column and the 2x
    # scaling is folded into the precomputed e_sq_half, so a single subtract
    # pass over the (K, TT) tile suffices.
    if use_bf16_matmul:
        xe = jnp.dot(e.astype(jnp.bfloat16), x.astype(jnp.bfloat16),
                     preferred_element_type=jnp.float32)            # (K, TT)
    else:
        xe = jnp.dot(e, x, preferred_element_type=jnp.float32)       # (K, TT)
    score = xe - e_sq_half                                           # (K, TT)

    # Per-column argmax over the codebook (first max index on ties, matching
    # torch.max().indices).
    max_val = jnp.max(score, axis=0, keepdims=True)                  # (1, TT)
    iota = jax.lax.broadcasted_iota(jnp.int32, (k, tt), 0)           # (K, TT)
    ind = jnp.min(jnp.where(score == max_val, iota, k),
                  axis=0, keepdims=True)                             # (1, TT)

    # Gather codebook rows via one-hot matmul (exact, MXU-friendly), kept in
    # f32 so the gathered values equal the codebook entries exactly.
    onehot = (iota == ind).astype(jnp.float32)                       # (K, TT)
    q = jnp.dot(e_t, onehot, preferred_element_type=jnp.float32)     # (C, TT)
    out_ref[0] = q

    if loss_refs:
        # Fused commitment-loss partial sum; mask columns past the true T
        # (ragged tail blocks contain undefined data in the padded lanes).
        loss_ref = loss_refs[0]
        col = (pl.program_id(1) * tt
               + jax.lax.broadcasted_iota(jnp.int32, (1, tt), 1))    # (1, TT)
        valid = col < t_total
        d2 = jnp.where(valid, (q - x) ** 2, 0.0)                     # (C, TT)
        # Replicate the scalar over an (8,128)-aligned tile so the store
        # stays dense; the wrapper reads element [..., 0, 0].
        loss_ref[...] = jnp.full(loss_ref.shape, jnp.sum(d2), dtype=jnp.float32)


def euclidean_codebook_quantize_bct(x_bct, embed, *, tile_t=2048,
                                    use_bf16_matmul=False,
                                    return_commit_partials=False):
    """x_bct: (B, C, T) f32, embed: (K, C) f32 -> (quantized (B, C, T) f32,
    optional per-tile sums of (q-x)^2 of shape (B, num_t_tiles))."""
    b, c, t = x_bct.shape
    k, d = embed.shape
    assert d == c, "codebook dim must match channel dim"

    # Hoisted per-codebook terms (computed once, not per tile).
    e_sq_half = 0.5 * jnp.sum(embed * embed, axis=-1, keepdims=True)  # (K, 1)
    embed_t = jnp.transpose(embed)                                    # (C, K)

    # Lane-dense T tile: a multiple of 128, as large as allowed; shrink if the
    # total grid would be too small to pipeline / shard across TensorCores.
    tile_t = max(128, (tile_t // 128) * 128)
    tt = min(tile_t, _round_up(t, 128))
    while b * pl.cdiv(t, tt) < 8 and tt > 512:
        tt = _round_up(max(512, tt // 2), 128)
    grid_t = pl.cdiv(t, tt)

    # VMEM budget: double-buffered (C,TT) in/out tiles + a handful of live
    # (K,TT) f32 intermediates (score / iota / onehot) + codebook constants.
    est = 4 * (4 * c * tt + 8 * k * tt + 4 * k * c + 2 * k * 128) + (4 << 20)
    vmem_limit = int(min(max(est, 32 << 20), 48 << 20))

    n = b * t
    cost = pl.CostEstimate(
        flops=4 * n * k * c,                  # distance matmul + one-hot gather
        transcendentals=0,
        bytes_accessed=2 * n * c * 4 + 2 * k * c * 4 + k * 4,
    )

    in_specs = [
        pl.BlockSpec((1, c, tt), lambda bi, ti: (bi, 0, ti)),   # x tile
        pl.BlockSpec((k, c), lambda bi, ti: (0, 0)),             # embed
        pl.BlockSpec((c, k), lambda bi, ti: (0, 0)),             # embed^T
        pl.BlockSpec((k, 1), lambda bi, ti: (0, 0)),             # 0.5*||e||^2
    ]
    out_shape = [jax.ShapeDtypeStruct((b, c, t), jnp.float32)]
    out_specs = [pl.BlockSpec((1, c, tt), lambda bi, ti: (bi, 0, ti))]
    if return_commit_partials:
        out_shape.append(jax.ShapeDtypeStruct((b, grid_t, 8, 128), jnp.float32))
        out_specs.append(pl.BlockSpec((1, 1, 8, 128), lambda bi, ti: (bi, ti, 0, 0)))

    kernel = functools.partial(_vq_kernel, t_total=t,
                               use_bf16_matmul=use_bf16_matmul)

    outs = pl.pallas_call(
        kernel,
        out_shape=tuple(out_shape),
        grid_spec=pltpu.PrefetchScalarGridSpec(
            num_scalar_prefetch=0,
            grid=(b, grid_t),
            in_specs=in_specs,
            out_specs=tuple(out_specs),
        ),
        compiler_params=pltpu.CompilerParams(
            dimension_semantics=("parallel", "parallel"),
            vmem_limit_bytes=vmem_limit,
        ),
        cost_estimate=cost,
    )(x_bct, embed, embed_t, e_sq_half)

    if return_commit_partials:
        quant, partials = outs
        return quant, partials[:, :, 0, 0]
    return outs[0], None


def vector_quantize_forward(x_bct, embed, *, calculate_commitment_loss=False,
                            commitment=1.0, tile_t=2048, use_bf16_matmul=False):
    """Forward pass of VectorQuantize (eval mode, use_shape_gain=False,
    channel_last=False, initted codebook).

    x_bct: (B, C, T) float32
    embed: (K, C)    float32 codebook
    Returns (quantize_bct, num_replace, commit_loss) like the PyTorch module.
    """
    quant_bct, partials = euclidean_codebook_quantize_bct(
        x_bct, embed, tile_t=tile_t, use_bf16_matmul=use_bf16_matmul,
        return_commit_partials=calculate_commitment_loss)

    if calculate_commitment_loss:
        b, c, t = x_bct.shape
        # MSE is permutation-invariant, so the (B,C,T)-layout mean equals
        # F.mse_loss on the (B,T,C) view.  Partial sums come from the kernel.
        commit_loss = jnp.sum(partials) / (b * c * t) * commitment
    else:
        commit_loss = None

    # eval mode: no EMA update, no straight-through estimator, no code expiry.
    num_replace = 0
    return quant_bct, num_replace, commit_loss


def _reference_forward(x_bct, embed):
    """Pure-JAX reference mirroring EuclideanCodebook.forward (eval)."""
    b, c, t = x_bct.shape
    x_btc = jnp.transpose(x_bct, (0, 2, 1))
    flatten = x_btc.reshape(b * t, c)
    e_t = embed.T
    distance = -(jnp.sum(flatten ** 2, axis=1, keepdims=True)
                 - 2.0 * flatten @ e_t
                 + jnp.sum(e_t ** 2, axis=0, keepdims=True))
    ind = jnp.argmax(distance, axis=-1)
    quant = embed[ind].reshape(b, t, c)
    return jnp.transpose(quant, (0, 2, 1))


if __name__ == "__main__":
    # Module config (EuclideanCodebook): dim = C = 32, codebook_size = 128.
    B, C, T = 2, 32, 8
    K = 128

    key = jax.random.PRNGKey(0)
    kx, ke, kx2 = jax.random.split(key, 3)
    x = jax.random.normal(kx, (B, C, T), dtype=jnp.float32)        # (b, c, t)
    embed = jax.random.normal(ke, (K, C), dtype=jnp.float32)       # torch.randn(K, dim)

    # Small-T path (lane extent rounded up to 128, single ragged tile).
    quantize, num_replace, commit_loss = vector_quantize_forward(x, embed)
    quantize = jax.block_until_ready(quantize)
    ref = jax.block_until_ready(_reference_forward(x, embed))
    assert quantize.shape == (B, C, T)
    assert jnp.allclose(quantize, ref, atol=1e-5, rtol=1e-5), "mismatch vs reference"
    assert num_replace == 0 and commit_loss is None

    # Multi-tile + ragged-T path (no wrapper pad/slice) with fused commit loss.
    T2 = 300
    x2 = jax.random.normal(kx2, (B, C, T2), dtype=jnp.float32)
    quant2, _, loss2 = vector_quantize_forward(
        x2, embed, tile_t=128, calculate_commitment_loss=True)
    quant2 = jax.block_until_ready(quant2)
    ref2 = jax.block_until_ready(_reference_forward(x2, embed))
    assert quant2.shape == (B, C, T2)
    assert jnp.allclose(quant2, ref2, atol=1e-5, rtol=1e-5), "mismatch vs reference (tiled)"
    ref_loss2 = jnp.mean((ref2 - x2) ** 2)
    assert jnp.allclose(loss2, ref_loss2, atol=1e-5, rtol=1e-4), "commit loss mismatch"

    # Default (large) tile path on the same ragged input: single 384-wide tile.
    quant3, _, loss3 = vector_quantize_forward(
        x2, embed, calculate_commitment_loss=True)
    quant3 = jax.block_until_ready(quant3)
    assert jnp.allclose(quant3, ref2, atol=1e-5, rtol=1e-5), "mismatch vs reference (default tile)"
    assert jnp.allclose(loss3, ref_loss2, atol=1e-5, rtol=1e-4), "commit loss mismatch (default tile)"

    print("KERNEL_OK")
</pallas_src>

<mosaic_0001>
module attributes {stable_mosaic.version = 11 : i64} {
  func.func @_vq_kernel(%arg0: i32, %arg1: i32, %arg2: memref<1x32x128xf32, #tpu.memory_space<vmem>>, %arg3: memref<128x32xf32, #tpu.memory_space<vmem>>, %arg4: memref<32x128xf32, #tpu.memory_space<vmem>>, %arg5: memref<128x1xf32, #tpu.memory_space<vmem>>, %arg6: memref<1x32x128xf32, #tpu.memory_space<vmem>>) attributes {dimension_semantics = [#tpu.dimension_semantics<parallel>, #tpu.dimension_semantics<parallel>], iteration_bounds = array<i64: 2, 1>, scalar_prefetch = 0 : i64, scratch_operands = 0 : i64, tpu.core_type = #tpu.core_type<tc>, window_params = [{transform_indices = @transform_0, window_bounds = array<i64: 1, 32, 128>}, {pipeline_mode = #tpu.pipeline_mode<synchronous>, transform_indices = @transform_1, window_bounds = array<i64: 128, 32>}, {pipeline_mode = #tpu.pipeline_mode<synchronous>, transform_indices = @transform_2, window_bounds = array<i64: 32, 128>}, {pipeline_mode = #tpu.pipeline_mode<synchronous>, transform_indices = @transform_3, window_bounds = array<i64: 128, 1>}, {transform_indices = @transform_4, window_bounds = array<i64: 1, 32, 128>}]} {
    %c0 = arith.constant 0 : index
    %c0_0 = arith.constant 0 : index
    %c0_1 = arith.constant 0 : index
    %0 = vector.load %arg2[%c0, %c0_0, %c0_1] : memref<1x32x128xf32, #tpu.memory_space<vmem>>, vector<1x32x128xf32>
    %1 = vector.shape_cast %0 : vector<1x32x128xf32> to vector<32x128xf32>
    %c0_2 = arith.constant 0 : index
    %c0_3 = arith.constant 0 : index
    %2 = vector.load %arg3[%c0_2, %c0_3] : memref<128x32xf32, #tpu.memory_space<vmem>>, vector<128x32xf32>
    %c0_4 = arith.constant 0 : index
    %c0_5 = arith.constant 0 : index
    %3 = vector.load %arg4[%c0_4, %c0_5] : memref<32x128xf32, #tpu.memory_space<vmem>>, vector<32x128xf32>
    %c0_6 = arith.constant 0 : index
    %c0_7 = arith.constant 0 : index
    %4 = vector.load %arg5[%c0_6, %c0_7] : memref<128x1xf32, #tpu.memory_space<vmem>>, vector<128x1xf32>
    %cst = arith.constant dense<0.000000e+00> : vector<128x128xf32>
    %5 = tpu.matmul %2, %1, %cst {dimension_numbers = #tpu.dot_dimension_numbers<[1], [0], [0], [1], [0, 0, 1, 1], [], []>} : vector<128x32xf32>, vector<32x128xf32>, vector<128x128xf32> -> vector<128x128xf32>
    %6 = vector.broadcast %4 : vector<128x1xf32> to vector<128x128xf32>
    %7 = arith.subf %5, %6 : vector<128x128xf32>
    %cst_8 = arith.constant dense<0xFF800000> : vector<128xf32>
    %8 = vector.multi_reduction <maximumf>, %7, %cst_8 [0] : vector<128x128xf32> to vector<128xf32>
    %9 = vector.shape_cast %8 : vector<128xf32> to vector<1x128xf32>
    %10 = tpu.iota {dimensions = array<i32: 0>} : vector<128x128xi32>
    %11 = vector.broadcast %9 : vector<1x128xf32> to vector<128x128xf32>
    %12 = arith.cmpf oeq, %7, %11 : vector<128x128xf32>
    %c128_i32 = arith.constant 128 : i32
    %13 = vector.broadcast %c128_i32 : i32 to vector<128x128xi32>
    %14 = arith.select %12, %10, %13 : vector<128x128xi1>, vector<128x128xi32>
    %cst_9 = arith.constant dense<2147483647> : vector<128xi32>
    %15 = vector.multi_reduction <minsi>, %14, %cst_9 [0] : vector<128x128xi32> to vector<128xi32>
    %16 = vector.shape_cast %15 : vector<128xi32> to vector<1x128xi32>
    %17 = vector.broadcast %16 : vector<1x128xi32> to vector<128x128xi32>
    %18 = arith.cmpi eq, %10, %17 : vector<128x128xi32>
    %19 = arith.extui %18 : vector<128x128xi1> to vector<128x128xi32>
    %20 = arith.sitofp %19 : vector<128x128xi32> to vector<128x128xf32>
    %cst_10 = arith.constant dense<0.000000e+00> : vector<32x128xf32>
    %21 = tpu.matmul %3, %20, %cst_10 {dimension_numbers = #tpu.dot_dimension_numbers<[1], [0], [0], [1], [0, 0, 1, 1], [], []>} : vector<32x128xf32>, vector<128x128xf32>, vector<32x128xf32> -> vector<32x128xf32>
    %c0_11 = arith.constant 0 : index
    %c0_12 = arith.constant 0 : index
    %c0_13 = arith.constant 0 : index
    %22 = vector.load %arg6[%c0_11, %c0_12, %c0_13] : memref<1x32x128xf32, #tpu.memory_space<vmem>>, vector<1x32x128xf32>
    %23 = vector.shape_cast %22 : vector<1x32x128xf32> to vector<32x128xf32>
    %24 = vector.shape_cast %21 : vector<32x128xf32> to vector<1x32x128xf32>
    tpu.vector_store %arg6[%c0_11, %c0_12, %c0_13], %24 {strides = array<i32>} : memref<1x32x128xf32, #tpu.memory_space<vmem>>, vector<1x32x128xf32>,
    return
  }
  func.func @transform_0(%arg0: i32, %arg1: i32) -> (i32, i32, i32) {
    %c0_i32 = arith.constant 0 : i32
    %c0_i32_0 = arith.constant 0 : i32
    return %arg0, %c0_i32, %arg1 : i32, i32, i32
  }
  func.func @transform_1(%arg0: i32, %arg1: i32) -> (i32, i32) {
    %c0_i32 = arith.constant 0 : i32
    %c0_i32_0 = arith.constant 0 : i32
    %c0_i32_1 = arith.constant 0 : i32
    return %c0_i32, %c0_i32_0 : i32, i32
  }
  func.func @transform_2(%arg0: i32, %arg1: i32) -> (i32, i32) {
    %c0_i32 = arith.constant 0 : i32
    %c0_i32_0 = arith.constant 0 : i32
    %c0_i32_1 = arith.constant 0 : i32
    return %c0_i32, %c0_i32_0 : i32, i32
  }
  func.func @transform_3(%arg0: i32, %arg1: i32) -> (i32, i32) {
    %c0_i32 = arith.constant 0 : i32
    %c0_i32_0 = arith.constant 0 : i32
    %c0_i32_1 = arith.constant 0 : i32
    return %c0_i32, %c0_i32_0 : i32, i32
  }
  func.func @transform_4(%arg0: i32, %arg1: i32) -> (i32, i32, i32) {
    %c0_i32 = arith.constant 0 : i32
    %c0_i32_0 = arith.constant 0 : i32
    return %arg0, %c0_i32, %arg1 : i32, i32, i32
  }
}

</mosaic_0001>

<bundles_post_ra>
// kernel: tpu_custom_call.1
= control target key start
LH: loop header
LB: loop body
LE: loop exit
PB: predicated region body
PF: predicated region fallthrough
CT: control target
= control target key end

     0   :  { %s917_s15 = smov 0   ;;  %s919_s16 = smov 0   ;;  %s1214_s0 = inlined_call_operand.vmem [shape: f32[2,32,8], index: 0, kind: input, shape index: {}]   ;;  %s1215_s1 = inlined_call_operand.vmem [shape: f32[128,32], index: 1, kind: input, shape index: {}]   ;;  %s1216_s2 = inlined_call_operand.vmem [shape: f32[32,128], index: 2, kind: input, shape index: {}]   ;;  %s1217_s3 = inlined_call_operand.vmem [shape: f32[128,1], index: 3, kind: input, shape index: {}]   ;;  %s1218_s4 = inlined_call_operand.vmem [shape: f32[2,32,8], index: 4, kind: output, shape index: {}]  }
   0x1   :  { %s921_s17 = smov 0  }
   0x2 LB: > { %s26_s18 = sadd.s32 1, %s884_s16  ;;  %p756_p0 = scmp.ge.s32.totalorder %s888_s17, 1  ;;  %s888_s17 = sphi %s921_s17, %s14_s17   ;;  %s884_s16 = sphi %s919_s16, %s1220_s16   ;;  %s880_s15 = sphi %s917_s15, %s1219_s15  }
   0x3   : > { %p28_p1 = scmp.ge.s32.totalorder %s26_s18, 2  ;;  %p181_p2 = scmp.lt.s32.totalorder %s888_s17, 3 }
   0x5   : > { %s1222_s18 = smov (%p28_p1, %s26_s18), 0  ;;  %p182_p3 = pnand %p756_p0, %p181_p2 }
   0x6   : > { %p213_p4 = scmp.lt.s32.totalorder (!%p182_p3), %s880_s15, 1 }
   0x7   : > { %185 = sbr.rel (%p182_p3) target bundleno = 425 (0x1a9), region = 36 }
   0xc   : > { %v253_v0 = vld [vmem:[%s1217_s3] sm:$0xff]  ;;  %v255_v1 = vld [vmem:[%s1217_s3 + $0x10] sm:$0xff]  ;;  %v890_v2 = vmov 0   ;;  %s1224_s15 = smov (!%p213_p4, %s880_s15), 1  ;;  %v254_v6 = vld [vmem:[%s1217_s3 + $0x8] sm:$0xff]  ;;  %vm269_vm0 = vcmask 261120  }
   0xd   : > { %863 = vset.pattern.permute.xlu0 %v890_v2  ;;  %864 = vset.pattern.permute.xlu1 %v890_v2  ;;  %s811_s23 = sshll.u32 %s1224_s15, 5  ;;  %v257_v3 = vld [vmem:[%s1217_s3 + $0x20] sm:$0xff]  ;;  %v256_v8 = vld [vmem:[%s1217_s3 + $0x18] sm:$0xff]  ;;  %v239_v11 = vld [vmem:[%s1215_s1 + $0x30] sm:$0xff] }
   0xe   : > { %385 = vperm.xlu0 %863, %v253_v0   ;;  %395 = vperm.xlu1 %864, %v255_v1   ;;  %s220_s26 = scalar_lea.vmem %s1214_s0, %s811_s23  ;;  %v233_v10 = vld [vmem:[%s1215_s1] sm:$0xff]  ;;  %v258_v13 = vld [vmem:[%s1217_s3 + $0x28] sm:$0xff]  ;;  %v259_v14 = vld [vmem:[%s1217_s3 + $0x30] sm:$0xff]  ;;  %s228_s8 = scalar_lea.vmem %s1218_s4, %s811_s23 }
   0xf   : > { %865 = vset.pattern.permute.xlu2 %v890_v2  ;;  %v232_v4 = vld [vmem:[%s220_s26 + $0x18] sm:$0xff]  ;;  %v231_v5 = vld [vmem:[%s220_s26 + $0x10] sm:$0xff]  ;;  %v230_v7 = vld [vmem:[%s220_s26 + $0x8] sm:$0xff] }
  0x10   : > { %405 = vperm.xlu2 %865, %v257_v3   ;;  %330 = vmatpush.msra.mxu0 %v232_v4  ;;  %v229_v9 = vld [vmem:[%s220_s26] sm:$0xff]  ;;  %v260_v15 = vld [vmem:[%s1217_s3 + $0x38] sm:$0xff]  ;;  %v234_v16 = vld [vmem:[%s1215_s1 + $0x8] sm:$0xff] }
  0x11   : > { %813 = vmatpush.msra.mxu2 %v232_v4  ;;  %814 = vmatpush.msra.mxu3 %v232_v4  ;;  %v245_v12 = vld [vmem:[%s1215_s1 + $0x60] sm:$0xff]  ;;  %v240_v17 = vld [vmem:[%s1215_s1 + $0x38] sm:$0xff]  ;;  %v246_v18 = vld [vmem:[%s1215_s1 + $0x68] sm:$0xff] }
  0x12   : > { %331 = vmatpush.msra.mxu0 %v231_v5  ;;  %v261_v19 = vld [vmem:[%s1217_s3 + $0x40] sm:$0xff]  ;;  %v262_v20 = vld [vmem:[%s1217_s3 + $0x48] sm:$0xff]  ;;  %v263_v21 = vld [vmem:[%s1217_s3 + $0x50] sm:$0xff] }
  0x13   : > { %815 = vmatpush.msra.mxu2 %v231_v5  ;;  %816 = vmatpush.msra.mxu3 %v231_v5  ;;  %v235_v22 = vld [vmem:[%s1215_s1 + $0x10] sm:$0xff]  ;;  %v241_v23 = vld [vmem:[%s1215_s1 + $0x40] sm:$0xff]  ;;  %v264_v25 = vld [vmem:[%s1217_s3 + $0x58] sm:$0xff] }
  0x14   : > { %332 = vmatpush.msra.mxu0 %v230_v7  ;;  %v247_v24 = vld [vmem:[%s1215_s1 + $0x70] sm:$0xff]  ;;  %v265_v26 = vld [vmem:[%s1217_s3 + $0x60] sm:$0xff]  ;;  %v266_v27 = vld [vmem:[%s1217_s3 + $0x68] sm:$0xff] }
  0x15   : > { %817 = vmatpush.msra.mxu2 %v230_v7  ;;  %818 = vmatpush.msra.mxu3 %v230_v7  ;;  %v236_v28 = vld [vmem:[%s1215_s1 + $0x18] sm:$0xff]  ;;  %v242_v29 = vld [vmem:[%s1215_s1 + $0x48] sm:$0xff]  ;;  %v267_v31 = vld [vmem:[%s1217_s3 + $0x70] sm:$0xff] }
  0x16   : > { %390 = vperm.xlu0 %863, %v254_v6   ;;  %400 = vperm.xlu1 %864, %v256_v8   ;;  %v248_v30 = vld [vmem:[%s1215_s1 + $0x78] sm:$0xff]  ;;  %v237_v33 = vld [vmem:[%s1215_s1 + $0x20] sm:$0xff]  ;;  %v243_v34 = vld [vmem:[%s1215_s1 + $0x50] sm:$0xff] }
  0x17   : > { %333 = vmatpush.msra.mxu0 %v229_v9  ;;  %819 = vmatpush.msra.mxu2 %v229_v9  ;;  %v268_v32 = vld [vmem:[%s1217_s3 + $0x78] sm:$0xff]  ;;  %v238_v35 = vld [vmem:[%s1215_s1 + $0x28] sm:$0xff] }
  0x18   : > { %820 = vmatpush.msra.mxu3 %v229_v9  ;;  %761 = vmatmul.msk.f32.vlgmr.msra.gmra.mxu0 %vm269_vm0, %v233_v10  ;;  %v244_v36 = vld [vmem:[%s1215_s1 + $0x58] sm:$0xff] }
  0x19   : > { %767 = vmatmul.msk.f32.vlgmr.msra.gmra.mxu2 %vm269_vm0, %v239_v11  ;;  %773 = vmatmul.msk.f32.vlgmr.msra.gmra.mxu3 %vm269_vm0, %v245_v12 }
  0x1a   : > { %410 = vperm.xlu2 %865, %v258_v13  }
  0x1e   : > { %415 = vperm.xlu0 %863, %v259_v14   ;;  %420 = vperm.xlu1 %864, %v260_v15  }
  0x20   : > { %762 = vmatmul.msk.f32.gmra.mxu0 %vm269_vm0, %v234_v16 }
  0x21   : > { %768 = vmatmul.msk.f32.gmra.mxu2 %vm269_vm0, %v240_v17  ;;  %774 = vmatmul.msk.f32.gmra.mxu3 %vm269_vm0, %v246_v18 }
  0x22   : > { %425 = vperm.xlu2 %865, %v261_v19  }
  0x26   : > { %430 = vperm.xlu0 %863, %v262_v20   ;;  %435 = vperm.xlu1 %864, %v263_v21  }
  0x28   : > { %763 = vmatmul.msk.f32.gmra.mxu0 %vm269_vm0, %v235_v22 }
  0x29   : > { %769 = vmatmul.msk.f32.gmra.mxu2 %vm269_vm0, %v241_v23  ;;  %775 = vmatmul.msk.f32.gmra.mxu3 %vm269_vm0, %v247_v24 }
  0x2a   : > { %440 = vperm.xlu2 %865, %v264_v25  }
  0x2e   : > { %445 = vperm.xlu0 %863, %v265_v26   ;;  %450 = vperm.xlu1 %864, %v266_v27  }
  0x30   : > { %764 = vmatmul.msk.f32.gmra.mxu0 %vm269_vm0, %v236_v28 }
  0x31   : > { %770 = vmatmul.msk.f32.gmra.mxu2 %vm269_vm0, %v242_v29  ;;  %776 = vmatmul.msk.f32.gmra.mxu3 %vm269_vm0, %v248_v30 }
  0x32   : > { %455 = vperm.xlu2 %865, %v267_v31  }
  0x36   : > { %460 = vperm.xlu0 %863, %v268_v32  }
  0x38   : > { %765 = vmatmul.msk.f32.gmra.mxu0 %vm269_vm0, %v237_v33 }
  0x39   : > { %771 = vmatmul.msk.f32.gmra.mxu2 %vm269_vm0, %v243_v34 }
  0x40   : > { %766 = vmatmul.msk.f32.gmra.mxu0 %vm269_vm0, %v238_v35 }
  0x41   : > { %772 = vmatmul.msk.f32.gmra.mxu2 %vm269_vm0, %v244_v36 }
  0x6a   : > { %v406_v41 = vpop.permute.xlu2 %405 }
  0x74   : > { %v411_v48 = vpop.permute.xlu2 %410 }
  0x7c   : > { %v426_v54 = vpop.permute.xlu2 %425 }
  0x80   : > { %v386_v37 = vpop.permute.xlu0 %385  ;;  %v396_v39 = vpop.permute.xlu1 %395 }
  0x84   : > { %v441_v60 = vpop.permute.xlu2 %440 }
  0x88   : > { %v391_v43 = vpop.permute.xlu0 %390  ;;  %v401_v44 = vpop.permute.xlu1 %400 }
  0x8c   : > { %v456_v24 = vpop.permute.xlu2 %455 }
  0x90   : > { %v416_v49 = vpop.permute.xlu0 %415  ;;  %v421_v51 = vpop.permute.xlu1 %420 }
  0x95   : > { %v335_v38 = vpop.f32.mrf.mxu0 }
  0x96   : > { %v1061_v3 = vsub.f32 %v335_v38, %v386_v37  ;;  %v500_v37 = vlaneseq }
  0x98   : > { %v431_v55 = vpop.permute.xlu0 %430  ;;  %v436_v58 = vpop.permute.xlu1 %435 }
  0x9c   : > { %v353_v40 = vpop.f32.mrf.mxu2  ;;  %v371_v47 = vpop.f32.mrf.mxu3 }
  0x9d   : > { %v338_v42 = vpop.f32.mrf.mxu0  ;;  %v1065_v5 = vsub.f32 %v353_v40, %v416_v49  ;;  %v1094_v40 = vshrl.u32 %v500_v37, 7 }
  0x9e   : > { %v1057_v1 = vsub.f32 %v338_v42, %v391_v43 }
  0x9f   : > { %v1097_v43 = vadd.s32 24, %v1094_v40 }
  0xa0   : > { %v446_v61 = vpop.permute.xlu0 %445  ;;  %v451_v7 = vpop.permute.xlu1 %450 }
  0xa1   : > { %v1084_v23 = vsub.f32 %v371_v47, %v446_v61  ;;  %v1109_v47 = vadd.s32 16, %v1094_v40 }
  0xa4   : > { %v356_v45 = vpop.f32.mrf.mxu2  ;;  %v374_v53 = vpop.f32.mrf.mxu3 }
  0xa5   : > { %v341_v46 = vpop.f32.mrf.mxu0  ;;  %v470_v12 = vsub.f32 %v356_v45, %v421_v51  ;;  %v1080_v16 = vsub.f32 %v374_v53, %v451_v7  ;;  %v1103_v45 = vadd.s32 88, %v1094_v40  ;;  %v1118_v51 = vadd.s32 48, %v1094_v40 }
  0xa6   : > { %v1063_v4 = vsub.f32 %v341_v46, %v396_v39  ;;  %v1106_v46 = vadd.s32 8, %v1094_v40  ;;  %v1124_v53 = vadd.s32 72, %v1094_v40 }
  0xa8   : > { %v481_v13 = vmax.f32 %v1063_v4, %v1065_v5  ;;  %v461_v25 = vpop.permute.xlu0 %460 }
  0xac   : > { %v359_v50 = vpop.f32.mrf.mxu2  ;;  %v377_v59 = vpop.f32.mrf.mxu3 }
  0xad   : > { %v344_v52 = vpop.f32.mrf.mxu0  ;;  %v1077_v14 = vsub.f32 %v359_v50, %v426_v54  ;;  %v1086_v26 = vsub.f32 %v377_v59, %v456_v24  ;;  %v1115_v50 = vadd.s32 40, %v1094_v40  ;;  %v1127_v54 = vadd.s32 80, %v1094_v40 }
  0xae   : > { %v466_v8 = vsub.f32 %v344_v52, %v401_v44  ;;  %v1100_v44 = vadd.s32 56, %v1094_v40  ;;  %v1121_v52 = vadd.s32 64, %v1094_v40 }
  0xb0   : > { %v482_v19 = vmax.f32 %v466_v8, %v470_v12 }
  0xb4   : > { %v362_v56 = vpop.f32.mrf.mxu2  ;;  %v380_v17 = vpop.f32.mrf.mxu3 }
  0xb5   : > { %v347_v57 = vpop.f32.mrf.mxu0  ;;  %v1069_v9 = vsub.f32 %v362_v56, %v431_v55  ;;  %v1088_v27 = vsub.f32 %v380_v17, %v461_v25  ;;  %v1130_v55 = vadd.s32 96, %v1094_v40  ;;  %v1133_v56 = vadd.s32 104, %v1094_v40 }
  0xb6   : > { %v1055_v63 = vsub.f32 %v347_v57, %v406_v41  ;;  %v1136_v57 = vadd.s32 112, %v1094_v40 }
  0xb8   : > { %v479_v10 = vmax.f32 %v1061_v3, %v1055_v63 }
  0xba   : > { %v483_v20 = vmax.f32 %v479_v10, %v1077_v14 }
  0xbc   : > { %v365_v62 = vpop.f32.mrf.mxu2  ;;  %v487_v30 = vmax.f32 %v483_v20, %v1084_v23 }
  0xbd   : > { %v350_v0 = vpop.f32.mrf.mxu0  ;;  %v1073_v11 = vsub.f32 %v365_v62, %v436_v58 }
  0xbe   : > { %v1059_v2 = vsub.f32 %v350_v0, %v411_v48  ;;  %v1112_v48 = vadd.s32 32, %v1094_v40 }
  0xbf   : > { %v485_v21 = vmax.f32 %v481_v13, %v1073_v11 }
  0xc0   : > { %v480_v6 = vmax.f32 %v1057_v1, %v1059_v2 }
  0xc1   : > { %v489_v31 = vmax.f32 %v485_v21, %v1086_v26 }
  0xc2   : > { %v484_v15 = vmax.f32 %v480_v6, %v1069_v9 }
  0xc4   : > { %v368_v18 = vpop.f32.mrf.mxu2  ;;  %v488_v28 = vmax.f32 %v484_v15, %v1080_v16 }
  0xc5   : > { %v474_v22 = vsub.f32 %v368_v18, %v441_v60  ;;  %v1141_v60 = vadd.s32 120, %v1094_v40 }
  0xc6   : > { %v491_v33 = vmax.f32 %v487_v30, %v488_v28 }
  0xc7   : > { %v486_v29 = vmax.f32 %v482_v19, %v474_v22 }
  0xc9   : > { %v490_v32 = vmax.f32 %v486_v29, %v1088_v27 }
  0xcb   : > { %v492_v34 = vmax.f32 %v489_v31, %v490_v32  ;;  %v891_v32 = vmov 1.0  }
  0xcd   : > { %v493_v35 = vmax.f32 %v491_v33, %v492_v34  ;;  %v249_v33 = vld [vmem:[%s1216_s2] sm:$0xff]  ;;  %v252_v34 = vld [vmem:[%s1216_s2 + $0x18] sm:$0xff] }
  0xcf   : > { %v494_v36 = vrot.slane %v493_v35, 4 }
  0xd1   : > { %v495_v38 = vmax.f32 %v493_v35, %v494_v36  ;;  %v250_v35 = vld [vmem:[%s1216_s2 + $0x8] sm:$0xff]  ;;  %v251_v36 = vld [vmem:[%s1216_s2 + $0x10] sm:$0xff] }
  0xd3   : > { %v496_v39 = vrot.slane %v495_v38, 2 }
  0xd5   : > { %v497_v41 = vmax.f32 %v495_v38, %v496_v39 }
  0xd7   : > { %v498_v42 = vrot.slane %v497_v41, 1 }
  0xd9   : > { %v499_v49 = vmax.f32 %v497_v41, %v498_v42 }
  0xdb   : > { %vm520_vm1 = vcmp.eq.f32.partialorder %v466_v8, %v499_v49  ;;  %vm524_vm2 = vcmp.eq.f32.partialorder %v470_v12, %v499_v49  ;;  %vm528_vm3 = vcmp.eq.f32.partialorder %v474_v22, %v499_v49  ;;  %vm517_vm4 = vcmp.eq.f32.partialorder %v1061_v3, %v499_v49 }
  0xdc   : > { %v536_v58 = vsel %vm520_vm1, %v1097_v43, 128  ;;  %v540_v59 = vsel %vm524_vm2, %v1100_v44, 128  ;;  %v544_v61 = vsel %vm528_vm3, %v1103_v45, 128  ;;  %vm518_vm6 = vcmp.eq.f32.partialorder %v1057_v1, %v499_v49 }
  0xdd   : > { %vm555_vm5 = vcmp.lt.s32.totalorder %v536_v58, %v540_v59  ;;  %vm519_vm7 = vcmp.eq.f32.partialorder %v1063_v4, %v499_v49  ;;  %vm521_vm8 = vcmp.eq.f32.partialorder %v1055_v63, %v499_v49  ;;  %vm522_vm9 = vcmp.eq.f32.partialorder %v1059_v2, %v499_v49 }
  0xde   : > { %v556_v62 = vsel %vm555_vm5, %v536_v58, %v540_v59  ;;  %vm523_vm10 = vcmp.eq.f32.partialorder %v1065_v5, %v499_v49  ;;  %vm525_vm12 = vcmp.eq.f32.partialorder %v1077_v14, %v499_v49  ;;  %vm526_vm13 = vcmp.eq.f32.partialorder %v1069_v9, %v499_v49 }
  0xdf   : > { %vm563_vm11 = vcmp.lt.s32.totalorder %v556_v62, %v544_v61  ;;  %vm527_vm14 = vcmp.eq.f32.partialorder %v1073_v11, %v499_v49  ;;  %vm529_vm15 = vcmp.eq.f32.partialorder %v1084_v23, %v499_v49  ;;  %vm532_vm0 = vcmp.eq.f32.partialorder %v1088_v27, %v499_v49 }
  0xe0   : > { %v564_v0 = vsel %vm563_vm11, %v556_v62, %v544_v61  ;;  %v533_v63 = vsel %vm517_vm4, %v1094_v40, 128  ;;  %v534_v1 = vsel %vm518_vm6, %v1106_v46, 128  ;;  %v535_v2 = vsel %vm519_vm7, %v1109_v47, 128 }
  0xe1   : > { %v537_v4 = vsel %vm521_vm8, %v1112_v48, 128  ;;  %v538_v5 = vsel %vm522_vm9, %v1115_v50, 128  ;;  %vm530_vm1 = vcmp.eq.f32.partialorder %v1080_v16, %v499_v49  ;;  %vm531_vm2 = vcmp.eq.f32.partialorder %v1086_v26, %v499_v49 }
  0xe2   : > { %v539_v6 = vsel %vm523_vm10, %v1118_v51, 128  ;;  %v541_v7 = vsel %vm525_vm12, %v1121_v52, 128  ;;  %v542_v8 = vsel %vm526_vm13, %v1124_v53, 128  ;;  %v543_v3 = vsel %vm527_vm14, %v1127_v54, 128 }
  0xe3   : > { %v545_v9 = vsel %vm529_vm15, %v1130_v55, 128  ;;  %v548_v10 = vsel %vm532_vm0, %v1141_v60, 128  ;;  %vm549_vm3 = vcmp.lt.s32.totalorder %v533_v63, %v537_v4  ;;  %vm551_vm4 = vcmp.lt.s32.totalorder %v534_v1, %v538_v5 }
  0xe4   : > { %vm553_vm5 = vcmp.lt.s32.totalorder %v535_v2, %v539_v6  ;;  %vm571_vm6 = vcmp.lt.s32.totalorder %v564_v0, %v548_v10  ;;  %v546_v11 = vsel %vm530_vm1, %v1133_v56, 128  ;;  %v550_v12 = vsel %vm549_vm3, %v533_v63, %v537_v4 }
  0xe5   : > { %v552_v13 = vsel %vm551_vm4, %v534_v1, %v538_v5  ;;  %v554_v14 = vsel %vm553_vm5, %v535_v2, %v539_v6  ;;  %v547_v15 = vsel %vm531_vm2, %v1136_v57, 128  ;;  %vm557_vm7 = vcmp.lt.s32.totalorder %v550_v12, %v541_v7 }
  0xe6   : > { %vm559_vm8 = vcmp.lt.s32.totalorder %v552_v13, %v542_v8  ;;  %vm561_vm9 = vcmp.lt.s32.totalorder %v554_v14, %v543_v3  ;;  %v558_v16 = vsel %vm557_vm7, %v550_v12, %v541_v7  ;;  %v572_v19 = vsel %vm571_vm6, %v564_v0, %v548_v10 }
  0xe7   : > { %v560_v17 = vsel %vm559_vm8, %v552_v13, %v542_v8  ;;  %v562_v18 = vsel %vm561_vm9, %v554_v14, %v543_v3  ;;  %vm565_vm10 = vcmp.lt.s32.totalorder %v558_v16, %v545_v9 }
  0xe8   : > { %vm567_vm11 = vcmp.lt.s32.totalorder %v560_v17, %v546_v11  ;;  %vm569_vm12 = vcmp.lt.s32.totalorder %v562_v18, %v547_v15  ;;  %v566_v20 = vsel %vm565_vm10, %v558_v16, %v545_v9 }
  0xe9   : > { %v568_v21 = vsel %vm567_vm11, %v560_v17, %v546_v11  ;;  %v570_v22 = vsel %vm569_vm12, %v562_v18, %v547_v15 }
  0xea   : > { %vm573_vm13 = vcmp.lt.s32.totalorder %v566_v20, %v568_v21  ;;  %vm575_vm14 = vcmp.lt.s32.totalorder %v570_v22, %v572_v19 }
  0xeb   : > { %v574_v23 = vsel %vm573_vm13, %v566_v20, %v568_v21  ;;  %v576_v24 = vsel %vm575_vm14, %v570_v22, %v572_v19 }
  0xec   : > { %vm577_vm15 = vcmp.lt.s32.totalorder %v574_v23, %v576_v24 }
  0xed   : > { %v578_v25 = vsel %vm577_vm15, %v574_v23, %v576_v24 }
  0xee   : > { %v579_v26 = vrot.slane %v578_v25, 4 }
  0xf0   : > { %vm580_vm0 = vcmp.lt.s32.totalorder %v578_v25, %v579_v26 }
  0xf1   : > { %v581_v27 = vsel %vm580_vm0, %v578_v25, %v579_v26 }
  0xf2   : > { %v582_v28 = vrot.slane %v581_v27, 2 }
  0xf4   : > { %vm583_vm1 = vcmp.lt.s32.totalorder %v581_v27, %v582_v28 }
  0xf5   : > { %v584_v29 = vsel %vm583_vm1, %v581_v27, %v582_v28 }
  0xf6   : > { %v585_v30 = vrot.slane %v584_v29, 1 }
  0xf8   : > { %vm586_vm2 = vcmp.lt.s32.totalorder %v584_v29, %v585_v30 }
  0xf9   : > { %v587_v31 = vsel %vm586_vm2, %v584_v29, %v585_v30 }
  0xfa   : > { %vm603_vm3 = vcmp.eq.s32.totalorder %v1141_v60, %v587_v31  ;;  %vm602_vm4 = vcmp.eq.s32.totalorder %v1136_v57, %v587_v31  ;;  %vm601_vm5 = vcmp.eq.s32.totalorder %v1133_v56, %v587_v31  ;;  %vm600_vm6 = vcmp.eq.s32.totalorder %v1130_v55, %v587_v31 }
  0xfb   : > { %793 = vmatpush.msk.msra.mxu1 %vm603_vm3, %v891_v32  ;;  %821 = vmatpush.msk.msrb.mxu3 %vm603_vm3, %v891_v32  ;;  %vm599_vm7 = vcmp.eq.s32.totalorder %v1103_v45, %v587_v31  ;;  %vm598_vm8 = vcmp.eq.s32.totalorder %v1127_v54, %v587_v31  ;;  %vm597_vm9 = vcmp.eq.s32.totalorder %v1124_v53, %v587_v31 }
  0xfc   : > { %vm596_vm10 = vcmp.eq.s32.totalorder %v1121_v52, %v587_v31  ;;  %vm595_vm11 = vcmp.eq.s32.totalorder %v1100_v44, %v587_v31  ;;  %vm594_vm12 = vcmp.eq.s32.totalorder %v1118_v51, %v587_v31  ;;  %vm593_vm13 = vcmp.eq.s32.totalorder %v1115_v50, %v587_v31 }
  0xfd   : > { %794 = vmatpush.msk.msra.mxu1 %vm602_vm4, %v891_v32  ;;  %822 = vmatpush.msk.msrb.mxu3 %vm602_vm4, %v891_v32  ;;  %vm592_vm14 = vcmp.eq.s32.totalorder %v1112_v48, %v587_v31  ;;  %vm591_vm15 = vcmp.eq.s32.totalorder %v1097_v43, %v587_v31  ;;  %vm590_vm0 = vcmp.eq.s32.totalorder %v1109_v47, %v587_v31 }
  0xfe   : > { %vm589_vm1 = vcmp.eq.s32.totalorder %v1106_v46, %v587_v31  ;;  %vm588_vm2 = vcmp.eq.s32.totalorder %v1094_v40, %v587_v31 }
  0xff   : > { %795 = vmatpush.msk.msra.mxu1 %vm601_vm5, %v891_v32  ;;  %823 = vmatpush.msk.msrb.mxu3 %vm601_vm5, %v891_v32 }
 0x101   : > { %796 = vmatpush.msk.msra.mxu1 %vm600_vm6, %v891_v32  ;;  %824 = vmatpush.msk.msrb.mxu3 %vm600_vm6, %v891_v32 }
 0x103   : > { %797 = vmatpush.msk.msra.mxu1 %vm599_vm7, %v891_v32  ;;  %825 = vmatpush.msk.msrb.mxu3 %vm599_vm7, %v891_v32 }
 0x105   : > { %798 = vmatpush.msk.msra.mxu1 %vm598_vm8, %v891_v32  ;;  %826 = vmatpush.msk.msrb.mxu3 %vm598_vm8, %v891_v32 }
 0x107   : > { %799 = vmatpush.msk.msra.mxu1 %vm597_vm9, %v891_v32  ;;  %827 = vmatpush.msk.msrb.mxu3 %vm597_vm9, %v891_v32 }
 0x109   : > { %800 = vmatpush.msk.msra.mxu1 %vm596_vm10, %v891_v32  ;;  %828 = vmatpush.msk.msrb.mxu3 %vm596_vm10, %v891_v32 }
 0x10b   : > { %801 = vmatpush.msk.msra.mxu1 %vm595_vm11, %v891_v32  ;;  %829 = vmatpush.msk.msrb.mxu3 %vm595_vm11, %v891_v32 }
 0x10d   : > { %802 = vmatpush.msk.msra.mxu1 %vm594_vm12, %v891_v32  ;;  %830 = vmatpush.msk.msrb.mxu3 %vm594_vm12, %v891_v32 }
 0x10f   : > { %803 = vmatpush.msk.msra.mxu1 %vm593_vm13, %v891_v32  ;;  %831 = vmatpush.msk.msrb.mxu3 %vm593_vm13, %v891_v32 }
 0x111   : > { %804 = vmatpush.msk.msra.mxu1 %vm592_vm14, %v891_v32  ;;  %832 = vmatpush.msk.msrb.mxu3 %vm592_vm14, %v891_v32 }
 0x113   : > { %805 = vmatpush.msk.msra.mxu1 %vm591_vm15, %v891_v32  ;;  %833 = vmatpush.msk.msrb.mxu3 %vm591_vm15, %v891_v32 }
 0x115   : > { %806 = vmatpush.msk.msra.mxu1 %vm590_vm0, %v891_v32  ;;  %834 = vmatpush.msk.msrb.mxu3 %vm590_vm0, %v891_v32 }
 0x117   : > { %807 = vmatpush.msk.msra.mxu1 %vm589_vm1, %v891_v32  ;;  %835 = vmatpush.msk.msrb.mxu3 %vm589_vm1, %v891_v32 }
 0x119   : > { %808 = vmatpush.msk.msra.mxu1 %vm588_vm2, %v891_v32  ;;  %836 = vmatpush.msk.msrb.mxu3 %vm588_vm2, %v891_v32 }
 0x11a   : > { %652 = vmatmul.f32.vlgmr.msra.gmra.mxu1 %v249_v33  ;;  %661 = vmatmul.f32.vlgmr.msrb.gmra.mxu3 %v252_v34 }
 0x122   : > { %655 = vmatmul.f32.gmra.mxu1 %v250_v35 }
 0x12a   : > { %658 = vmatmul.f32.gmra.mxu1 %v251_v36 }
 0x197   : > { %v653_v37 = vpop.f32.mrf.mxu1 }
 0x198   : > { %665 = vst [vmem:[%s228_s8] sm:$0xff] %v653_v37 }
 0x19d   : > { %v662_v38 = vpop.f32.mrf.mxu3 }
 0x19e   : > { %668 = vst [vmem:[%s228_s8 + $0x18] sm:$0xff] %v662_v38 }
 0x19f   : > { %v656_v39 = vpop.f32.mrf.mxu1 }
 0x1a0   : > { %666 = vst [vmem:[%s228_s8 + $0x8] sm:$0xff] %v656_v39 }
 0x1a7   : > { %v659_v40 = vpop.f32.mrf.mxu1 }
 0x1a8   : > { %667 = vst [vmem:[%s228_s8 + $0x10] sm:$0xff] %v659_v40 }
 0x1a9 PF: > { %s14_s17 = sadd.s32 1, %s888_s17   ;;  %s1219_s15 = smov %s884_s16 }
 0x1aa   : > { %p11_p5 = scmp.ge.s32.totalorder %s14_s17, 4   ;;  %s1220_s16 = smov %s1222_s18 }
 0x1ac   :  { %13 = sbr.rel (!%p11_p5) target bundleno = 2 (0x2), region = 66 }

</bundles_post_ra>
